<compile_context>
chip_gen: v6e
topology: v6e:2x2x1
jax: 0.10.0
libtpu: 0.0.40
codegen_flags: <defaults>
</compile_context>

<pallas_src>
import functools

import jax
import jax.numpy as jnp
from jax.experimental import pallas as pl
from jax.experimental.pallas import tpu as pltpu

_LANE = 128


def _round_up(x, m):
    return ((x + m - 1) // m) * m


def _device_kind():
    try:
        return jax.devices()[0].device_kind.lower()
    except Exception:
        return ""


def _pick_act_dtype():
    # v5e has no bf16 VPU/EUP path -> keep the swish in f32 there; bf16 elsewhere.
    return jnp.float32 if "v5" in _device_kind() else jnp.bfloat16


def _pick_batch_tile(B):
    Bp8 = _round_up(B, 8)
    if "v7" in _device_kind():
        # 2 TensorCores per chip: make the parallel batch axis at least 2 grid steps
        # (when the batch is big enough to keep tiles >= ~256 rows), cap for VMEM.
        if Bp8 >= 512:
            return min(_round_up(pl.cdiv(Bp8, 2), 8), 2048)
        return Bp8
    # Single-TC chips (v5e/v6e): big tiles amortize the ~0.35us per-grid-step overhead.
    return min(Bp8, 4096)


def _mlp_kernel(s_ref, a_ref, w1s_ref, w1a_ref, b1_ref, w2_ref, b2_ref,
                w3_ref, b3_ref, diff_ref, rew_ref, *, act_dtype, out_state_dim):
    """One batch tile of the fused 3-layer swish MLP (concat folded into layer 1)."""
    # Layer 1: concat fused as two bf16 matmuls sharing one f32 accumulator.
    h = (jnp.dot(s_ref[...].astype(jnp.bfloat16), w1s_ref[...],
                 preferred_element_type=jnp.float32)
         + jnp.dot(a_ref[...].astype(jnp.bfloat16), w1a_ref[...],
                   preferred_element_type=jnp.float32)
         + b1_ref[...])
    h = h.astype(act_dtype)
    h = (h * jax.nn.sigmoid(h)).astype(jnp.bfloat16)            # swish / SiLU

    # Layer 2.
    h = jnp.dot(h, w2_ref[...], preferred_element_type=jnp.float32) + b2_ref[...]
    h = h.astype(act_dtype)
    h = (h * jax.nn.sigmoid(h)).astype(jnp.bfloat16)            # swish / SiLU

    # Layer 3 (identity last activation); split directly into the two outputs.
    y = jnp.dot(h, w3_ref[...], preferred_element_type=jnp.float32) + b3_ref[...]
    diff_ref[...] = y[:, :out_state_dim].astype(diff_ref.dtype)
    rew_ref[...] = y[:, out_state_dim:].astype(rew_ref.dtype)


def prepare_params(params, state_dim):
    """Pad hidden dims to 128 lanes, split w1 for the fused concat, cast weights to bf16.

    Call ONCE (outside the per-step rollout loop); the result feeds rdynamics_forward.
    Zero-padded lanes stay exactly 0 through swish (bias pads are 0, swish(0)=0).
    """
    h1 = params["w1"].shape[1]
    h2 = params["w2"].shape[1]
    h1p = _round_up(h1, _LANE)
    h2p = _round_up(h2, _LANE)
    w1 = params["w1"]
    return {
        "w1_s": jnp.pad(w1[:state_dim], ((0, 0), (0, h1p - h1))).astype(jnp.bfloat16),
        "w1_a": jnp.pad(w1[state_dim:], ((0, 0), (0, h1p - h1))).astype(jnp.bfloat16),
        "b1": jnp.pad(params["b1"], ((0, 0), (0, h1p - h1))),
        "w2": jnp.pad(params["w2"], ((0, h1p - h1), (0, h2p - h2))).astype(jnp.bfloat16),
        "b2": jnp.pad(params["b2"], ((0, 0), (0, h2p - h2))),
        "w3": jnp.pad(params["w3"], ((0, h2p - h2), (0, 0))).astype(jnp.bfloat16),
        "b3": params["b3"],
    }


def rdynamics_forward(states, actions, prepared, *, output_state_dim,
                      batch_tile=None, act_dtype=None):
    """Pallas implementation of RDynamics.forward.

    states:   [B, state_dim]   float32
    actions:  [B, action_dim]  float32
    prepared: output of prepare_params()
    """
    B, state_dim = states.shape
    action_dim = actions.shape[1]
    h1p = prepared["w1_s"].shape[1]
    h2p = prepared["w2"].shape[1]
    out_dim = prepared["w3"].shape[1]
    reward_dim = out_dim - output_state_dim

    # ---- Batch tiling (always 8-aligned). ----
    if batch_tile is None:
        batch_tile = _pick_batch_tile(B)
    batch_tile = max(8, _round_up(min(batch_tile, _round_up(B, 8)), 8))
    Bp = _round_up(B, batch_tile)
    if Bp != B:
        states = jnp.pad(states, ((0, Bp - B), (0, 0)))
        actions = jnp.pad(actions, ((0, Bp - B), (0, 0)))

    if act_dtype is None:
        act_dtype = _pick_act_dtype()

    grid = (Bp // batch_tile,)
    rep = lambda shape: pl.BlockSpec(shape, lambda i: (0, 0))

    cost = pl.CostEstimate(
        flops=int(2 * Bp * ((state_dim + action_dim) * h1p + h1p * h2p + h2p * out_dim)),
        transcendentals=int(Bp * (h1p + h2p)),                   # sigmoid exps
        bytes_accessed=int(4 * Bp * (state_dim + action_dim + out_dim)
                           + 2 * ((state_dim + action_dim) * h1p
                                  + h1p * h2p + h2p * out_dim)
                           + 4 * (h1p + h2p + out_dim)),
    )

    kernel = functools.partial(_mlp_kernel, act_dtype=act_dtype,
                               out_state_dim=output_state_dim)

    diff, rew = pl.pallas_call(
        kernel,
        out_shape=(jax.ShapeDtypeStruct((Bp, output_state_dim), jnp.float32),
                   jax.ShapeDtypeStruct((Bp, reward_dim), jnp.float32)),
        grid_spec=pltpu.PrefetchScalarGridSpec(
            num_scalar_prefetch=0,
            grid=grid,
            in_specs=[
                pl.BlockSpec((batch_tile, state_dim), lambda i: (i, 0)),
                pl.BlockSpec((batch_tile, action_dim), lambda i: (i, 0)),
                rep((state_dim, h1p)), rep((action_dim, h1p)), rep((1, h1p)),
                rep((h1p, h2p)), rep((1, h2p)),
                rep((h2p, out_dim)), rep((1, out_dim)),
            ],
            out_specs=(
                pl.BlockSpec((batch_tile, output_state_dim), lambda i: (i, 0)),
                pl.BlockSpec((batch_tile, reward_dim), lambda i: (i, 0)),
            ),
        ),
        compiler_params=pltpu.CompilerParams(
            dimension_semantics=("parallel",),
            vmem_limit_bytes=32 * 1024 * 1024),   # explicit: > v5e's 16 MiB default
        cost_estimate=cost,
    )(states, actions, prepared["w1_s"], prepared["w1_a"], prepared["b1"],
      prepared["w2"], prepared["b2"], prepared["w3"], prepared["b3"])

    if Bp != B:
        diff = diff[:B]
        rew = rew[:B]
    return {"diff_states": diff, "rewards": rew}


def _truncated_norm_init(key, fan_in, fan_out):
    # truncated_norm_init from MBPO: truncated normal, std = 1 / (2*sqrt(fan_in)),
    # truncated to +/- 2 std. Bias init is constant 0.
    std = 1.0 / (2.0 * jnp.sqrt(jnp.asarray(fan_in, jnp.float32)))
    w = jax.random.truncated_normal(key, -2.0, 2.0, (fan_in, fan_out), jnp.float32)
    return w * std


def make_params(key, state_dim, action_dim, reward_dim, hidden_dims,
                output_state_dim):
    in_dim = state_dim + action_dim
    out_dim = output_state_dim + reward_dim
    dims = [in_dim] + list(hidden_dims) + [out_dim]
    keys = jax.random.split(key, len(dims) - 1)
    params = {}
    for li, (d_in, d_out) in enumerate(zip(dims[:-1], dims[1:]), start=1):
        params[f"w{li}"] = _truncated_norm_init(keys[li - 1], d_in, d_out)
        params[f"b{li}"] = jnp.zeros((1, d_out), jnp.float32)
    return params


def _reference_forward(states, actions, params, output_state_dim):
    """Plain-JAX f32 reference for a sanity check."""
    x = jnp.concatenate([states, actions], axis=-1)
    h = x @ params["w1"] + params["b1"]
    h = h * jax.nn.sigmoid(h)
    h = h @ params["w2"] + params["b2"]
    h = h * jax.nn.sigmoid(h)
    y = h @ params["w3"] + params["b3"]
    return y[..., :output_state_dim], y[..., output_state_dim:]


if __name__ == "__main__":
    # Small, module-consistent shapes.
    state_dim, action_dim, reward_dim = 12, 4, 1
    output_state_dim = state_dim
    hidden_dims = [32, 32]
    batch = 32

    key = jax.random.PRNGKey(0)
    k_params, k_s, k_a = jax.random.split(key, 3)

    params = make_params(k_params, state_dim, action_dim, reward_dim,
                         hidden_dims, output_state_dim)
    # Pad / split / bf16-cast the weights once, outside the per-step call path.
    prepared = prepare_params(params, state_dim)

    states = jax.random.normal(k_s, (batch, state_dim), jnp.float32)
    actions = jax.random.normal(k_a, (batch, action_dim), jnp.float32)

    fwd = jax.jit(functools.partial(rdynamics_forward,
                                    output_state_dim=output_state_dim))
    out = fwd(states, actions, prepared)
    jax.block_until_ready(out)

    # Sanity check against a plain-JAX f32 reference (bf16 matmuls -> looser tol).
    ref_diff, ref_rew = _reference_forward(states, actions, params,
                                           output_state_dim)
    assert out["diff_states"].shape == (batch, output_state_dim)
    assert out["rewards"].shape == (batch, reward_dim)
    assert jnp.allclose(out["diff_states"], ref_diff, atol=5e-2, rtol=5e-2)
    assert jnp.allclose(out["rewards"], ref_rew, atol=5e-2, rtol=5e-2)

    print("KERNEL_OK")
</pallas_src>

<mosaic_0001>
module attributes {stable_mosaic.version = 11 : i64} {
  func.func @_mlp_kernel(%arg0: i32, %arg1: memref<32x12xf32, #tpu.memory_space<vmem>>, %arg2: memref<32x4xf32, #tpu.memory_space<vmem>>, %arg3: memref<12x128xbf16, #tpu.memory_space<vmem>>, %arg4: memref<4x128xbf16, #tpu.memory_space<vmem>>, %arg5: memref<1x128xf32, #tpu.memory_space<vmem>>, %arg6: memref<128x128xbf16, #tpu.memory_space<vmem>>, %arg7: memref<1x128xf32, #tpu.memory_space<vmem>>, %arg8: memref<128x13xbf16, #tpu.memory_space<vmem>>, %arg9: memref<1x13xf32, #tpu.memory_space<vmem>>, %arg10: memref<32x12xf32, #tpu.memory_space<vmem>>, %arg11: memref<32x1xf32, #tpu.memory_space<vmem>>) attributes {dimension_semantics = [#tpu.dimension_semantics<parallel>], iteration_bounds = array<i64: 1>, scalar_prefetch = 0 : i64, scratch_operands = 0 : i64, tpu.core_type = #tpu.core_type<tc>, window_params = [{transform_indices = @transform_0, window_bounds = array<i64: 32, 12>}, {transform_indices = @transform_1, window_bounds = array<i64: 32, 4>}, {pipeline_mode = #tpu.pipeline_mode<synchronous>, transform_indices = @transform_2, window_bounds = array<i64: 12, 128>}, {pipeline_mode = #tpu.pipeline_mode<synchronous>, transform_indices = @transform_3, window_bounds = array<i64: 4, 128>}, {pipeline_mode = #tpu.pipeline_mode<synchronous>, transform_indices = @transform_4, window_bounds = array<i64: 1, 128>}, {pipeline_mode = #tpu.pipeline_mode<synchronous>, transform_indices = @transform_5, window_bounds = array<i64: 128, 128>}, {pipeline_mode = #tpu.pipeline_mode<synchronous>, transform_indices = @transform_6, window_bounds = array<i64: 1, 128>}, {pipeline_mode = #tpu.pipeline_mode<synchronous>, transform_indices = @transform_7, window_bounds = array<i64: 128, 13>}, {pipeline_mode = #tpu.pipeline_mode<synchronous>, transform_indices = @transform_8, window_bounds = array<i64: 1, 13>}, {transform_indices = @transform_9, window_bounds = array<i64: 32, 12>}, {transform_indices = @transform_10, window_bounds = array<i64: 32, 1>}]} {
    %c0 = arith.constant 0 : index
    %c0_0 = arith.constant 0 : index
    %0 = vector.load %arg1[%c0, %c0_0] : memref<32x12xf32, #tpu.memory_space<vmem>>, vector<32x12xf32>
    %1 = arith.truncf %0 : vector<32x12xf32> to vector<32x12xbf16>
    %c0_1 = arith.constant 0 : index
    %c0_2 = arith.constant 0 : index
    %2 = vector.load %arg3[%c0_1, %c0_2] : memref<12x128xbf16, #tpu.memory_space<vmem>>, vector<12x128xbf16>
    %cst = arith.constant dense<0.000000e+00> : vector<32x128xf32>
    %3 = tpu.matmul %1, %2, %cst {dimension_numbers = #tpu.dot_dimension_numbers<[1], [0], [0], [1], [0, 0, 1, 1], [], []>} : vector<32x12xbf16>, vector<12x128xbf16>, vector<32x128xf32> -> vector<32x128xf32>
    %c0_3 = arith.constant 0 : index
    %c0_4 = arith.constant 0 : index
    %4 = vector.load %arg2[%c0_3, %c0_4] : memref<32x4xf32, #tpu.memory_space<vmem>>, vector<32x4xf32>
    %5 = arith.truncf %4 : vector<32x4xf32> to vector<32x4xbf16>
    %c0_5 = arith.constant 0 : index
    %c0_6 = arith.constant 0 : index
    %6 = vector.load %arg4[%c0_5, %c0_6] : memref<4x128xbf16, #tpu.memory_space<vmem>>, vector<4x128xbf16>
    %cst_7 = arith.constant dense<0.000000e+00> : vector<32x128xf32>
    %7 = tpu.matmul %5, %6, %cst_7 {dimension_numbers = #tpu.dot_dimension_numbers<[1], [0], [0], [1], [0, 0, 1, 1], [], []>} : vector<32x4xbf16>, vector<4x128xbf16>, vector<32x128xf32> -> vector<32x128xf32>
    %8 = arith.addf %3, %7 : vector<32x128xf32>
    %c0_8 = arith.constant 0 : index
    %c0_9 = arith.constant 0 : index
    %9 = vector.load %arg5[%c0_8, %c0_9] : memref<1x128xf32, #tpu.memory_space<vmem>>, vector<1x128xf32>
    %10 = vector.broadcast %9 : vector<1x128xf32> to vector<32x128xf32>
    %11 = arith.addf %8, %10 : vector<32x128xf32>
    %12 = arith.truncf %11 : vector<32x128xf32> to vector<32x128xbf16>
    %13 = arith.negf %12 : vector<32x128xbf16>
    %14 = math.exp %13 : vector<32x128xbf16>
    %cst_10 = arith.constant 1.000000e+00 : bf16
    %15 = vector.broadcast %cst_10 : bf16 to vector<32x128xbf16>
    %16 = arith.addf %15, %14 : vector<32x128xbf16>
    %17 = arith.divf %15, %16 : vector<32x128xbf16>
    %18 = arith.mulf %12, %17 : vector<32x128xbf16>
    %c0_11 = arith.constant 0 : index
    %c0_12 = arith.constant 0 : index
    %19 = vector.load %arg6[%c0_11, %c0_12] : memref<128x128xbf16, #tpu.memory_space<vmem>>, vector<128x128xbf16>
    %cst_13 = arith.constant dense<0.000000e+00> : vector<32x128xf32>
    %20 = tpu.matmul %18, %19, %cst_13 {dimension_numbers = #tpu.dot_dimension_numbers<[1], [0], [0], [1], [0, 0, 1, 1], [], []>} : vector<32x128xbf16>, vector<128x128xbf16>, vector<32x128xf32> -> vector<32x128xf32>
    %c0_14 = arith.constant 0 : index
    %c0_15 = arith.constant 0 : index
    %21 = vector.load %arg7[%c0_14, %c0_15] : memref<1x128xf32, #tpu.memory_space<vmem>>, vector<1x128xf32>
    %22 = vector.broadcast %21 : vector<1x128xf32> to vector<32x128xf32>
    %23 = arith.addf %20, %22 : vector<32x128xf32>
    %24 = arith.truncf %23 : vector<32x128xf32> to vector<32x128xbf16>
    %25 = arith.negf %24 : vector<32x128xbf16>
    %26 = math.exp %25 : vector<32x128xbf16>
    %cst_16 = arith.constant 1.000000e+00 : bf16
    %27 = vector.broadcast %cst_16 : bf16 to vector<32x128xbf16>
    %28 = arith.addf %27, %26 : vector<32x128xbf16>
    %29 = arith.divf %27, %28 : vector<32x128xbf16>
    %30 = arith.mulf %24, %29 : vector<32x128xbf16>
    %c0_17 = arith.constant 0 : index
    %c0_18 = arith.constant 0 : index
    %31 = vector.load %arg8[%c0_17, %c0_18] : memref<128x13xbf16, #tpu.memory_space<vmem>>, vector<128x13xbf16>
    %cst_19 = arith.constant dense<0.000000e+00> : vector<32x13xf32>
    %32 = tpu.matmul %30, %31, %cst_19 {dimension_numbers = #tpu.dot_dimension_numbers<[1], [0], [0], [1], [0, 0, 1, 1], [], []>} : vector<32x128xbf16>, vector<128x13xbf16>, vector<32x13xf32> -> vector<32x13xf32>
    %c0_20 = arith.constant 0 : index
    %c0_21 = arith.constant 0 : index
    %33 = vector.load %arg9[%c0_20, %c0_21] : memref<1x13xf32, #tpu.memory_space<vmem>>, vector<1x13xf32>
    %34 = vector.broadcast %33 : vector<1x13xf32> to vector<32x13xf32>
    %35 = arith.addf %32, %34 : vector<32x13xf32>
    %36 = vector.extract_strided_slice %35 {offsets = [0, 0], sizes = [32, 12], strides = [1, 1]} : vector<32x13xf32> to vector<32x12xf32>
    %c0_22 = arith.constant 0 : index
    %c0_23 = arith.constant 0 : index
    %37 = vector.load %arg10[%c0_22, %c0_23] : memref<32x12xf32, #tpu.memory_space<vmem>>, vector<32x12xf32>
    tpu.vector_store %arg10[%c0_22, %c0_23], %36 {strides = array<i32>} : memref<32x12xf32, #tpu.memory_space<vmem>>, vector<32x12xf32>,
    %38 = vector.extract_strided_slice %35 {offsets = [0, 12], sizes = [32, 1], strides = [1, 1]} : vector<32x13xf32> to vector<32x1xf32>
    %c0_24 = arith.constant 0 : index
    %c0_25 = arith.constant 0 : index
    %39 = vector.load %arg11[%c0_24, %c0_25] : memref<32x1xf32, #tpu.memory_space<vmem>>, vector<32x1xf32>
    tpu.vector_store %arg11[%c0_24, %c0_25], %38 {strides = array<i32>} : memref<32x1xf32, #tpu.memory_space<vmem>>, vector<32x1xf32>,
    return
  }
  func.func @transform_0(%arg0: i32) -> (i32, i32) {
    %c0_i32 = arith.constant 0 : i32
    %c0_i32_0 = arith.constant 0 : i32
    return %arg0, %c0_i32 : i32, i32
  }
  func.func @transform_1(%arg0: i32) -> (i32, i32) {
    %c0_i32 = arith.constant 0 : i32
    %c0_i32_0 = arith.constant 0 : i32
    return %arg0, %c0_i32 : i32, i32
  }
  func.func @transform_2(%arg0: i32) -> (i32, i32) {
    %c0_i32 = arith.constant 0 : i32
    %c0_i32_0 = arith.constant 0 : i32
    %c0_i32_1 = arith.constant 0 : i32
    return %c0_i32, %c0_i32_0 : i32, i32
  }
  func.func @transform_3(%arg0: i32) -> (i32, i32) {
    %c0_i32 = arith.constant 0 : i32
    %c0_i32_0 = arith.constant 0 : i32
    %c0_i32_1 = arith.constant 0 : i32
    return %c0_i32, %c0_i32_0 : i32, i32
  }
  func.func @transform_4(%arg0: i32) -> (i32, i32) {
    %c0_i32 = arith.constant 0 : i32
    %c0_i32_0 = arith.constant 0 : i32
    %c0_i32_1 = arith.constant 0 : i32
    return %c0_i32, %c0_i32_0 : i32, i32
  }
  func.func @transform_5(%arg0: i32) -> (i32, i32) {
    %c0_i32 = arith.constant 0 : i32
    %c0_i32_0 = arith.constant 0 : i32
    %c0_i32_1 = arith.constant 0 : i32
    return %c0_i32, %c0_i32_0 : i32, i32
  }
  func.func @transform_6(%arg0: i32) -> (i32, i32) {
    %c0_i32 = arith.constant 0 : i32
    %c0_i32_0 = arith.constant 0 : i32
    %c0_i32_1 = arith.constant 0 : i32
    return %c0_i32, %c0_i32_0 : i32, i32
  }
  func.func @transform_7(%arg0: i32) -> (i32, i32) {
    %c0_i32 = arith.constant 0 : i32
    %c0_i32_0 = arith.constant 0 : i32
    %c0_i32_1 = arith.constant 0 : i32
    return %c0_i32, %c0_i32_0 : i32, i32
  }
  func.func @transform_8(%arg0: i32) -> (i32, i32) {
    %c0_i32 = arith.constant 0 : i32
    %c0_i32_0 = arith.constant 0 : i32
    %c0_i32_1 = arith.constant 0 : i32
    return %c0_i32, %c0_i32_0 : i32, i32
  }
  func.func @transform_9(%arg0: i32) -> (i32, i32) {
    %c0_i32 = arith.constant 0 : i32
    %c0_i32_0 = arith.constant 0 : i32
    return %arg0, %c0_i32 : i32, i32
  }
  func.func @transform_10(%arg0: i32) -> (i32, i32) {
    %c0_i32 = arith.constant 0 : i32
    %c0_i32_0 = arith.constant 0 : i32
    return %arg0, %c0_i32 : i32, i32
  }
}

</mosaic_0001>

<bundles_post_ra>
// kernel: rdynamics_forward.1
= control target key start
LH: loop header
LB: loop body
LE: loop exit
PB: predicated region body
PF: predicated region fallthrough
CT: control target
= control target key end

     0   :  { %vm58_vm0 = vcmask 1041408   ;;  %vm123_vm1 = vcmask 1045504   ;;  %vm51_vm2 = vcmask 31744   ;;  %vm116_vm3 = vcmask 97280   ;;  %s638_s21 = smov 116   ;;  %s815_s3 = inlined_call_operand.vmem [shape: bf16[4,128], index: 3, kind: input, shape index: {}]   ;;  %s816_s2 = inlined_call_operand.vmem [shape: bf16[12,128], index: 2, kind: input, shape index: {}]   ;;  %s817_s1 = inlined_call_operand.vmem [shape: f32[32,4], index: 1, kind: input, shape index: {}]   ;;  %s818_s0 = inlined_call_operand.vmem [shape: f32[32,12], index: 0, kind: input, shape index: {}]   ;;  %s819_s5 = inlined_call_operand.vmem [shape: bf16[128,128], index: 5, kind: input, shape index: {}]   ;;  %s820_s4 = inlined_call_operand.vmem [shape: f32[1,128], index: 4, kind: input, shape index: {}]   ;;  %s821_s7 = inlined_call_operand.vmem [shape: bf16[128,13], index: 7, kind: input, shape index: {}]   ;;  %s822_s6 = inlined_call_operand.vmem [shape: f32[1,128], index: 6, kind: input, shape index: {}]   ;;  %s823_s8 = inlined_call_operand.vmem [shape: f32[1,13], index: 8, kind: input, shape index: {}]   ;;  %s824_s9 = inlined_call_operand.vmem [shape: f32[32,12], index: 9, kind: output, shape index: {0}]   ;;  %s825_s10 = inlined_call_operand.vmem [shape: f32[32,1], index: 10, kind: output, shape index: {1}]  }
   0x1   :  { %v50_v0 = vld [vmem:[%s815_s3] sm:$0x3]  ;;  %v45_v4 = vld [vmem:[%s817_s1 + $0x8] sm:$0xff]  ;;  %v46_v6 = vld [vmem:[%s817_s1 + $0x10] sm:$0xff]  ;;  %vm483_vm4 = vcmask 7168  }
   0x2   :  { %602 = vmatprep.subr.msk.bf16.mxu0 %vm58_vm0, %v50_v0  ;;  %v60_v1 = vsel %vm58_vm0, %v50_v0, 0  ;;  %v605_v2 = vld [vmem:[%s816_s2] sm:$0x3f]   ;;  %v47_v7 = vld [vmem:[%s817_s1 + $0x18] sm:$0xff]  ;;  %v37_v11 = vld [vmem:[%s818_s0 + $0x8] sm:$0xff] }
   0x3   :  { %v44_v3 = vld [vmem:[%s817_s1] sm:$0xff]  ;;  %551 = vmatpush3.bf16.msra.mxu0 %v60_v1  ;;  %603 = vmatprep.subr.msk.bf16.mxu1 %vm123_vm1, %v605_v2  ;;  %v125_v9 = vsel %vm123_vm1, %v605_v2, 0  ;;  %v49_v10 = vpack.c.bf16 %v47_v7, %v46_v6  ;;  %v38_v12 = vld [vmem:[%s818_s0 + $0x10] sm:$0xff]  ;;  %v39_v13 = vld [vmem:[%s818_s0 + $0x18] sm:$0xff] }
   0x4   :  { %v48_v5 = vpack.c.bf16 %v45_v4, %v44_v3  ;;  %v36_v8 = vld [vmem:[%s818_s0] sm:$0xff]  ;;  %557 = vmatpush3.bf16.msra.mxu1 %v125_v9  ;;  %v41_v15 = vpack.c.bf16 %v39_v13, %v38_v12  ;;  %v606_v16 = vld [vmem:[%s819_s5 + $0x38] sm:$0xff]   ;;  %v607_v17 = vld [vmem:[%s819_s5 + $0x30] sm:$0xff]  }
   0x5   :  { %v40_v14 = vpack.c.bf16 %v37_v11, %v36_v8  ;;  %562 = vmatprep.subr.bf16.mxu0 %v606_v16  ;;  %v608_v18 = vld [vmem:[%s819_s5 + $0x28] sm:$0xff]   ;;  %v609_v19 = vld [vmem:[%s819_s5 + $0x20] sm:$0xff]   ;;  %v610_v20 = vld [vmem:[%s819_s5 + $0x18] sm:$0xff]  }
   0x6   :  { %552 = vmatprep.mubr.msk.bf16.mxu0 %vm51_vm2, %v48_v5  ;;  %v611_v21 = vld [vmem:[%s819_s5 + $0x10] sm:$0xff]   ;;  %v612_v22 = vld [vmem:[%s819_s5 + $0x8] sm:$0xff]   ;;  %v613_v23 = vld [vmem:[%s819_s5] sm:$0xff]  }
   0x7   :  { %553 = vmatmul.mubr.msk.bf16.vlgmr.msra.gmra.mxu0 %vm51_vm2, %v49_v10  ;;  %558 = vmatprep.mubr.msk.bf16.mxu1 %vm116_vm3, %v40_v14  ;;  %v501_v30 = vld [vmem:[%s820_s4] ss:$0 sm:$0xff]  ;;  %v614_v55 = vld [vmem:[%s821_s7 + $0x38] sm:$0xff]   ;;  %v615_v56 = vld [vmem:[%s821_s7 + $0x30] sm:$0xff]  }
   0x8   :  { %559 = vmatmul.mubr.msk.bf16.vlgmr.msra.gmra.mxu1 %vm116_vm3, %v41_v15  ;;  %563 = vmatpush3.bf16.msra.mxu0 %v606_v16  ;;  %v616_v57 = vld [vmem:[%s821_s7 + $0x28] sm:$0xff]   ;;  %v617_v58 = vld [vmem:[%s821_s7 + $0x20] sm:$0xff]   ;;  %v618_v59 = vld [vmem:[%s821_s7 + $0x18] sm:$0xff]  }
   0x9   :  { %564 = vmatprep.subr.bf16.mxu0 %v607_v17  ;;  %582 = vmatprep.subr.bf16.mxu1 %v614_v55  ;;  %v619_v60 = vld [vmem:[%s821_s7 + $0x10] sm:$0xff]   ;;  %v620_v61 = vld [vmem:[%s821_s7 + $0x8] sm:$0xff]   ;;  %v621_v62 = vld [vmem:[%s821_s7] sm:$0xff]  }
   0xa   :  { %583 = vmatpush3.bf16.msra.mxu1 %v614_v55  ;;  %v504_v0 = vld [vmem:[%s822_s6] ss:$0 sm:$0xff] }
   0xb   :  { %584 = vmatprep.subr.bf16.mxu1 %v615_v56 }
   0xc   :  { %565 = vmatpush3.bf16.msra.mxu0 %v607_v17 }
   0xd   :  { %566 = vmatprep.subr.bf16.mxu0 %v608_v18 }
   0xe   :  { %585 = vmatpush3.bf16.msra.mxu1 %v615_v56 }
   0xf   :  { %586 = vmatprep.subr.bf16.mxu1 %v616_v57 }
  0x10   :  { %567 = vmatpush3.bf16.msra.mxu0 %v608_v18 }
  0x11   :  { %568 = vmatprep.subr.bf16.mxu0 %v609_v19 }
  0x12   :  { %587 = vmatpush3.bf16.msra.mxu1 %v616_v57 }
  0x13   :  { %588 = vmatprep.subr.bf16.mxu1 %v617_v58 }
  0x14   :  { %569 = vmatpush3.bf16.msra.mxu0 %v609_v19 }
  0x15   :  { %570 = vmatprep.subr.bf16.mxu0 %v610_v20 }
  0x16   :  { %589 = vmatpush3.bf16.msra.mxu1 %v617_v58 }
  0x17   :  { %590 = vmatprep.subr.bf16.mxu1 %v618_v59 }
  0x18   :  { %571 = vmatpush3.bf16.msra.mxu0 %v610_v20 }
  0x19   :  { %572 = vmatprep.subr.bf16.mxu0 %v611_v21 }
  0x1a   :  { %591 = vmatpush3.bf16.msra.mxu1 %v618_v59 }
  0x1b   :  { %592 = vmatprep.subr.bf16.mxu1 %v619_v60 }
  0x1c   :  { %573 = vmatpush3.bf16.msra.mxu0 %v611_v21 }
  0x1d   :  { %574 = vmatprep.subr.bf16.mxu0 %v612_v22 }
  0x1e   :  { %593 = vmatpush3.bf16.msra.mxu1 %v619_v60 }
  0x1f   :  { %594 = vmatprep.subr.bf16.mxu1 %v620_v61 }
  0x20   :  { %575 = vmatpush3.bf16.msra.mxu0 %v612_v22  ;;  %v515_v22 = vld [vmem:[%s823_s8] ss:$0 sm:$0xff] }
  0x21   :  { %576 = vmatprep.subr.bf16.mxu0 %v613_v23 }
  0x22   :  { %595 = vmatpush3.bf16.msra.mxu1 %v620_v61 }
  0x23   :  { %596 = vmatprep.subr.bf16.mxu1 %v621_v62 }
  0x24   :  { %577 = vmatpush3.bf16.msra.mxu0 %v613_v23 }
  0x26   :  { %597 = vmatpush3.bf16.msra.mxu1 %v621_v62 }
  0xc7   :  { %v554_v24 = vpop.f32.mrf.mxu0 }
  0xc8   :  { %v560_v26 = vpop.f32.mrf.mxu1 }
  0xc9   :  { %v96_v25 = vpop.f32.mrf.mxu0  ;;  %v170_v29 = vadd.f32 %v560_v26, %v554_v24 }
  0xca   :  { %v161_v28 = vpop.f32.mrf.mxu1 }
  0xcb   :  { %v555_v27 = vpop.f32.mrf.mxu0  ;;  %v162_v33 = vadd.f32 %v161_v28, %v96_v25  ;;  %v185_v36 = vadd.f32 %v501_v30, %v170_v29 }
  0xcc   :  { %v561_v32 = vpop.f32.mrf.mxu1 }
  0xcd   :  { %v99_v31 = vpop.f32.mrf.mxu0  ;;  %v173_v34 = vadd.f32 %v561_v32, %v555_v27  ;;  %v183_v39 = vadd.f32 %v501_v30, %v162_v33 }
  0xce   :  { %v164_v35 = vpop.f32.mrf.mxu1 }
  0xcf   :  { %v186_v37 = vadd.f32 %v501_v30, %v173_v34  ;;  %v165_v38 = vadd.f32 %v164_v35, %v99_v31 }
  0xd1   :  { %v188_v40 = vpack.c.bf16 %v186_v37, %v185_v36  ;;  %v184_v41 = vadd.f32 %v501_v30, %v165_v38 }
  0xd3   :  { %v503_v42 = vmul.bf16 3216621497, %v188_v40  ;;  %v187_v43 = vpack.c.bf16 %v184_v41, %v183_v39 }
  0xd5   :  { %622 = vpow.bf16 %v503_v42  ;;  %v502_v44 = vmul.bf16 3216621497, %v187_v43 }
  0xd7   :  { %624 = vpow.bf16 %v502_v44 }
  0xe3   :  { %v623_v45 = vpop.eup %622 }
  0xe4   :  { %v198_v46 = vadd.bf16 1065369472, %v623_v45 }
  0xe5   :  { %v625_v47 = vpop.eup %624 }
  0xe6   :  { %626 = vrcp.bf16 %v198_v46  ;;  %v197_v48 = vadd.bf16 1065369472, %v625_v47 }
  0xe8   :  { %628 = vrcp.bf16 %v197_v48 }
  0xf4   :  { %v627_v49 = vpop.eup %626 }
  0xf5   :  { %v202_v51 = vmul.bf16 1065369472, %v627_v49 }
  0xf6   :  { %v629_v50 = vpop.eup %628 }
  0xf7   :  { %v200_v52 = vmul.bf16 1065369472, %v629_v50  ;;  %v204_v54 = vmul.bf16 %v202_v51, %v188_v40 }
  0xf9   :  { %v203_v53 = vmul.bf16 %v200_v52, %v187_v43 }
  0xfb   :  { %578 = vmatprep.mubr.bf16.mxu0 %v203_v53 }
  0xfc   :  { %579 = vmatmul.mubr.bf16.vlgmr.msra.gmra.mxu0 %v204_v54 }
 0x1bc   :  { %v580_v63 = vpop.f32.mrf.mxu0 }
 0x1bd   :  { %v319_v3 = vadd.f32 %v580_v63, %v504_v0 }
 0x1be   :  { %v310_v1 = vpop.f32.mrf.mxu0 }
 0x1bf   :  { %v311_v6 = vadd.f32 %v504_v0, %v310_v1 }
 0x1c0   :  { %v581_v2 = vpop.f32.mrf.mxu0 }
 0x1c1   :  { %v322_v4 = vadd.f32 %v581_v2, %v504_v0 }
 0x1c2   :  { %v313_v5 = vpop.f32.mrf.mxu0 }
 0x1c3   :  { %v326_v7 = vpack.c.bf16 %v322_v4, %v319_v3  ;;  %v314_v8 = vadd.f32 %v504_v0, %v313_v5 }
 0x1c5   :  { %v514_v9 = vmul.bf16 3216621497, %v326_v7  ;;  %v325_v10 = vpack.c.bf16 %v314_v8, %v311_v6 }
 0x1c7   :  { %630 = vpow.bf16 %v514_v9  ;;  %v513_v11 = vmul.bf16 3216621497, %v325_v10 }
 0x1c9   :  { %632 = vpow.bf16 %v513_v11 }
 0x1d5   :  { %v631_v12 = vpop.eup %630 }
 0x1d6   :  { %v336_v13 = vadd.bf16 1065369472, %v631_v12 }
 0x1d7   :  { %v633_v14 = vpop.eup %632 }
 0x1d8   :  { %634 = vrcp.bf16 %v336_v13  ;;  %v335_v15 = vadd.bf16 1065369472, %v633_v14 }
 0x1da   :  { %636 = vrcp.bf16 %v335_v15 }
 0x1e6   :  { %v635_v16 = vpop.eup %634 }
 0x1e7   :  { %v340_v18 = vmul.bf16 1065369472, %v635_v16 }
 0x1e8   :  { %v637_v17 = vpop.eup %636 }
 0x1e9   :  { %v338_v19 = vmul.bf16 1065369472, %v637_v17  ;;  %v342_v21 = vmul.bf16 %v340_v18, %v326_v7 }
 0x1eb   :  { %v341_v20 = vmul.bf16 %v338_v19, %v325_v10 }
 0x1ed   :  { %598 = vmatprep.mubr.bf16.mxu1 %v341_v20 }
 0x1ee   :  { %599 = vmatmul.mubr.bf16.vlgmr.msra.gmra.mxu1 %v342_v21 }
 0x2ae   :  { %v600_v23 = vpop.f32.mrf.mxu1 }
 0x2af   :  { %v457_v24 = vadd.f32 %v600_v23, %v515_v22 }
 0x2b0   :  { %v448_v25 = vpop.f32.mrf.mxu1 }
 0x2b1   :  { %465 = vst.msk [vmem:[%s824_s9 + $0x10] sm:$0xff] %vm116_vm3, %v457_v24  ;;  %v449_v26 = vadd.f32 %v515_v22, %v448_v25  ;;  %475 = vrot.lane.b32.xlu1 %v457_v24, %s638_s21 }
 0x2b2   :  { %v601_v27 = vpop.f32.mrf.mxu1 }
 0x2b3   :  { %463 = vst.msk [vmem:[%s824_s9] sm:$0xff] %vm116_vm3, %v449_v26  ;;  %v460_v28 = vadd.f32 %v601_v27, %v515_v22  ;;  %471 = vrot.lane.b32.xlu0 %v449_v26, %s638_s21 }
 0x2b4   :  { %v451_v29 = vpop.f32.mrf.mxu1 }
 0x2b5   :  { %466 = vst.msk [vmem:[%s824_s9 + $0x18] sm:$0xff] %vm116_vm3, %v460_v28  ;;  %v452_v30 = vadd.f32 %v515_v22, %v451_v29  ;;  %477 = vrot.lane.b32.xlu1 %v460_v28, %s638_s21 }
 0x2b7   :  { %464 = vst.msk [vmem:[%s824_s9 + $0x8] sm:$0xff] %vm116_vm3, %v452_v30  ;;  %473 = vrot.lane.b32.xlu0 %v452_v30, %s638_s21 }
 0x323   :  { %v476_v31 = vpop.permute.xlu1 %475 }
 0x324   :  { %486 = vst.msk [vmem:[%s825_s10 + $0x10] sm:$0xff] %vm483_vm4, %v476_v31 }
 0x325   :  { %v472_v32 = vpop.permute.xlu0 %471 }
 0x326   :  { %484 = vst.msk [vmem:[%s825_s10] sm:$0xff] %vm483_vm4, %v472_v32 }
 0x327   :  { %v478_v33 = vpop.permute.xlu1 %477 }
 0x328   :  { %487 = vst.msk [vmem:[%s825_s10 + $0x18] sm:$0xff] %vm483_vm4, %v478_v33 }
 0x329   :  { %v474_v34 = vpop.permute.xlu0 %473 }
 0x32a   :  { %485 = vst.msk [vmem:[%s825_s10 + $0x8] sm:$0xff] %vm483_vm4, %v474_v34 }

</bundles_post_ra>
